<compile_context>
chip_gen: v7x
topology: tpu7x:2x2x1
jax: 0.10.0
libtpu: 0.0.40
codegen_flags: <defaults>
</compile_context>

<pallas_src>
import functools

import jax
import jax.numpy as jnp
from jax.experimental import pallas as pl
from jax.experimental.pallas import tpu as pltpu


# --------------------------------------------------------------------------
# Kernels
# --------------------------------------------------------------------------
def _single_step_kernel(x_ref, w_ref, o_ref, *, inv_s):
    # x_ref: [tile_n, C, S] (native dtype), w_ref: [K, C] (native dtype),
    # o_ref: [1, tile_n, K] float32 (partial scores, bias added in wrapper).
    pooled = jnp.sum(x_ref[...], axis=-1, dtype=jnp.float32) * inv_s   # [tile_n, C]
    o_ref[0] = jax.lax.dot_general(
        pooled, w_ref[...].astype(jnp.float32),
        dimension_numbers=(((1,), (1,)), ((), ())),
        preferred_element_type=jnp.float32)


def _multi_step_kernel(x_ref, w_ref, o_ref, acc_ref, *,
                       s_total, tile_s, s_tiles, s_per_split,
                       lane_chunks, ragged, may_overhang):
    # x_ref  : [tile_n, C, tile_s]   (native dtype)
    # w_ref  : [K, C]                (native dtype, resident across the grid)
    # o_ref  : [1, tile_n, K]        float32 partial scores (no bias)
    # acc_ref: [tile_n, C, 128]      f32 lane-shaped running sum over S
    c = pl.program_id(0)             # S-split index (TensorCore work split)
    s = pl.program_id(2)             # step inside this split
    s_global = c * s_per_split + s   # global S-tile index (may overhang)

    @pl.when(s == 0)
    def _init():
        acc_ref[...] = jnp.zeros_like(acc_ref)

    def _accumulate(apply_mask):
        base = s_global * tile_s
        partial = None
        for j in range(lane_chunks):          # unrolled, 128-lane chunks
            chunk = x_ref[:, :, pl.ds(j * 128, 128)].astype(jnp.float32)
            if apply_mask:
                col = (jax.lax.broadcasted_iota(jnp.int32, (1, 1, 128), 2)
                       + (base + j * 128))
                chunk = jnp.where(col < s_total, chunk, 0.0)
            partial = chunk if partial is None else partial + chunk
        # Pure element-wise VPU adds; layout stays lane-shaped (no XLU here).
        acc_ref[...] += partial

    if ragged:
        # Only the single padded tile pays the iota/compare/select cost.
        @pl.when(s_global == s_tiles - 1)
        def _ragged():
            _accumulate(True)

        @pl.when(s_global < s_tiles - 1)
        def _plain():
            _accumulate(False)
    elif may_overhang:
        @pl.when(s_global < s_tiles)
        def _valid():
            _accumulate(False)
    else:
        _accumulate(False)

    @pl.when(s == s_per_split - 1)
    def _finalize():
        # One cross-lane (XLU) reduce per (split, N-tile), then the matmul.
        pooled = jnp.sum(acc_ref[...], axis=-1) * (1.0 / float(s_total))
        o_ref[0] = jax.lax.dot_general(
            pooled, w_ref[...].astype(jnp.float32),
            dimension_numbers=(((1,), (1,)), ((), ())),
            preferred_element_type=jnp.float32)


# --------------------------------------------------------------------------
# Generation-aware sizing helpers
# --------------------------------------------------------------------------
def _vmem_capacity_bytes():
    try:
        cap = int(pltpu.get_tpu_info().vmem_capacity_bytes)
        if cap > 0:
            return cap
    except Exception:
        pass
    return 128 << 20            # v5e / v6e physical VMEM


def _tensorcores_per_device():
    """Best-effort TensorCore count (performance hint only; any value is safe)."""
    try:
        info = pltpu.get_tpu_info()
        for name in ("num_cores", "core_count", "num_tensorcores",
                     "tensorcores_per_chip"):
            v = getattr(info, name, None)
            if isinstance(v, int) and v >= 1:
                return v
    except Exception:
        pass
    try:
        kind = jax.devices()[0].device_kind.lower()
        if any(tag in kind for tag in ("v4", "v5p", "v7", "7x")):
            return 2            # megacore / dual-TensorCore generations
    except Exception:
        pass
    return 1


def _footprint_bytes(tile_n, tile_s, C, K, S, x_itemsize, w_itemsize):
    multi = tile_s < S
    act = 2 * tile_n * C * tile_s * x_itemsize   # double-buffered activation
    acc = tile_n * C * 128 * 4 if multi else 0   # lane-shaped f32 accumulator
    wgt = 2 * K * C * w_itemsize                 # resident weight (count 2x)
    out = 2 * tile_n * K * 4
    return act + acc + wgt + out


def _choose_tiles(N, C, S, K, x_itemsize, w_itemsize, vmem_cap):
    """Pick (tile_n, tile_s): big blocks to amortize the ~0.35 us per-step
    overhead, with the whole footprint inside the per-generation VMEM budget."""
    if vmem_cap <= (64 << 20):        # v7x-class: 64 MiB physical per TC
        max_block = 10 << 20
        scoped_cap = 52 << 20
    else:                             # v5e / v6e: 128 MiB physical
        max_block = 12 << 20
        scoped_cap = 96 << 20

    if N <= 8:
        n_cands = [N]
    else:
        n_cands = [N] + list(range(((N - 1) // 8) * 8, 7, -8))
    s_cands = [S] + [v for v in (1024, 512, 256, 128) if v < S]

    for ts in s_cands:                # prefer large, lane-dense S blocks
        for tn in n_cands:            # then as much of N as still fits
            block = tn * C * ts * x_itemsize
            if (block <= max_block and
                    _footprint_bytes(tn, ts, C, K, S, x_itemsize, w_itemsize)
                    <= scoped_cap):
                return tn, ts
    # TODO(synk): extreme in_channels would need C-tiling with a split matmul;
    # fall back to the smallest legal tile and let vmem_limit stretch to fit.
    return (N if N <= 8 else 8), (S if S <= 128 else 128)


# --------------------------------------------------------------------------
# Wrapper
# --------------------------------------------------------------------------
def i3d_head_forward(x_ncthw, weight, bias, *, tile_n=None, tile_s=None,
                     core_split=None):
    """x_ncthw: [N, C, T, H, W]  (PyTorch NCTHW convention)
       weight : [K, C]           (PyTorch nn.Linear layout, native dtype)
       bias   : [K]
       returns cls_score [N, K]  float32
    """
    N, C, T, H, W = x_ncthw.shape
    K = weight.shape[0]
    S = T * H * W

    # Free view (T/H/W contiguous): no HBM transpose, one pass over the data.
    x_ncs = x_ncthw.reshape(N, C, S)

    x_itemsize = jnp.dtype(x_ncs.dtype).itemsize
    w_itemsize = jnp.dtype(weight.dtype).itemsize
    vmem_cap = _vmem_capacity_bytes()

    auto_n, auto_s = _choose_tiles(N, C, S, K, x_itemsize, w_itemsize, vmem_cap)
    tile_n = auto_n if tile_n is None else min(int(tile_n), N)
    tile_s = auto_s if tile_s is None else min(int(tile_s), S)
    if tile_n < N and tile_n % 8 != 0:
        tile_n = max(8, (tile_n // 8) * 8)        # (8,128) rule on [tile_n, K]
    if tile_s < S and tile_s % 128 != 0:
        tile_s = max(128, (tile_s // 128) * 128)  # lane-dense S tiles

    n_tiles = pl.cdiv(N, tile_n)
    s_tiles = pl.cdiv(S, tile_s)
    multi_step = tile_s < S

    # Work-split across TensorCores along S when the N grid has a single tile.
    if core_split is None:
        core_split = 2 if (multi_step and n_tiles == 1 and s_tiles >= 2
                           and _tensorcores_per_device() >= 2) else 1
    n_split = max(1, int(core_split)) if multi_step else 1
    n_split = min(n_split, max(1, s_tiles))

    need = _footprint_bytes(tile_n, tile_s, C, K, S, x_itemsize, w_itemsize)
    vmem_limit = int(min(max(need + (4 << 20), 32 << 20),
                         int(vmem_cap * 0.85)))

    cost = pl.CostEstimate(
        flops=N * C * S + 2 * n_split * N * C * K,
        transcendentals=0,
        bytes_accessed=(N * C * S * x_itemsize + K * C * w_itemsize
                        + n_split * N * K * 4))

    if not multi_step:
        kernel = functools.partial(_single_step_kernel, inv_s=1.0 / float(S))
        partial_scores = pl.pallas_call(
            kernel,
            out_shape=jax.ShapeDtypeStruct((1, N, K), jnp.float32),
            grid=(n_tiles,),
            in_specs=[
                pl.BlockSpec((tile_n, C, S), lambda n: (n, 0, 0)),
                pl.BlockSpec((K, C), lambda n: (0, 0)),
            ],
            out_specs=pl.BlockSpec((1, tile_n, K), lambda n: (0, n, 0)),
            compiler_params=pltpu.CompilerParams(
                dimension_semantics=("parallel",),
                vmem_limit_bytes=vmem_limit),
            cost_estimate=cost,
        )(x_ncs, weight)
    else:
        s_per_split = pl.cdiv(s_tiles, n_split)
        may_overhang = n_split * s_per_split > s_tiles
        kernel = functools.partial(
            _multi_step_kernel,
            s_total=S, tile_s=tile_s, s_tiles=s_tiles, s_per_split=s_per_split,
            lane_chunks=tile_s // 128, ragged=(S % tile_s != 0),
            may_overhang=may_overhang)

        if may_overhang:
            # Clamp so the overhang step of the last split issues an in-bounds
            # DMA; its contribution is skipped inside the kernel.
            def x_map(c, n, s):
                return (n, 0, jnp.minimum(c * s_per_split + s, s_tiles - 1))
        else:
            def x_map(c, n, s):
                return (n, 0, c * s_per_split + s)

        partial_scores = pl.pallas_call(
            kernel,
            out_shape=jax.ShapeDtypeStruct((n_split, N, K), jnp.float32),
            grid=(n_split, n_tiles, s_per_split),
            in_specs=[
                pl.BlockSpec((tile_n, C, tile_s), x_map),
                pl.BlockSpec((K, C), lambda c, n, s: (0, 0)),
            ],
            out_specs=pl.BlockSpec((1, tile_n, K), lambda c, n, s: (c, n, 0)),
            scratch_shapes=[pltpu.VMEM((tile_n, C, 128), jnp.float32)],
            compiler_params=pltpu.CompilerParams(
                dimension_semantics=("parallel", "parallel", "arbitrary"),
                vmem_limit_bytes=vmem_limit),
            cost_estimate=cost,
        )(x_ncs, weight)

    # Tiny epilogue: combine S-split partials and add bias.
    return jnp.sum(partial_scores, axis=0) + bias.astype(jnp.float32)[None, :]


# --------------------------------------------------------------------------
# Self-test
# --------------------------------------------------------------------------
if __name__ == "__main__":
    key = jax.random.PRNGKey(0)
    k1, k2, k3 = jax.random.split(key, 3)

    def reference(x, w, b):
        pooled = jnp.mean(x.astype(jnp.float32), axis=(2, 3, 4))
        return pooled @ w.astype(jnp.float32).T + b.astype(jnp.float32)

    # Test 1: small I3D-style head (N=2, C=32, T=H=W=4, K=8): single S step.
    N, C, T, H, W, K = 2, 32, 4, 4, 4, 8
    x = jax.random.normal(k1, (N, C, T, H, W), dtype=jnp.float32)
    fc_w = 0.01 * jax.random.normal(k2, (K, C), dtype=jnp.float32)
    fc_b = 0.1 * jnp.arange(K, dtype=jnp.float32)
    out = jax.block_until_ready(i3d_head_forward(x, fc_w, fc_b))
    assert out.shape == (N, K) and out.dtype == jnp.float32
    assert jnp.allclose(out, reference(x, fc_w, fc_b), atol=1e-5, rtol=1e-5)

    # Test 2: forced S tiling (S=192, tile_s=128 -> ragged masked last tile),
    # exercising the lane-shaped accumulator + pl.when-gated mask.
    N2, C2, T2, H2, W2 = 2, 32, 4, 6, 8
    x2 = jax.random.normal(k3, (N2, C2, T2, H2, W2), dtype=jnp.float32)
    out2 = jax.block_until_ready(
        i3d_head_forward(x2, fc_w, fc_b, tile_n=N2, tile_s=128))
    assert jnp.allclose(out2, reference(x2, fc_w, fc_b), atol=1e-5, rtol=1e-5)

    # Test 3: bf16 activations + bf16 weights (native-dtype weight path),
    # f32 accumulation and f32 logits.
    x2_bf16 = x2.astype(jnp.bfloat16)
    w_bf16 = fc_w.astype(jnp.bfloat16)
    out3 = jax.block_until_ready(
        i3d_head_forward(x2_bf16, w_bf16, fc_b, tile_n=N2, tile_s=128))
    assert out3.dtype == jnp.float32
    assert jnp.allclose(out3, reference(x2_bf16, w_bf16, fc_b),
                        atol=2e-2, rtol=2e-2)

    # Test 4: forced two-way S split (dual-TensorCore path) with an odd number
    # of S tiles (S=320, tile_s=128 -> 3 tiles: one ragged tile and one
    # clamped / skipped overhang step on the second split).
    x4 = jax.random.normal(jax.random.PRNGKey(7), (2, 32, 4, 8, 10),
                           dtype=jnp.float32)
    out4 = jax.block_until_ready(
        i3d_head_forward(x4, fc_w, fc_b, tile_n=2, tile_s=128, core_split=2))
    assert jnp.allclose(out4, reference(x4, fc_w, fc_b), atol=1e-5, rtol=1e-5)

    # Test 5: N tiling (N=16 -> two N tiles of 8) on the single-S-step path.
    x5 = jax.random.normal(jax.random.PRNGKey(11), (16, 32, 2, 4, 8),
                           dtype=jnp.float32)
    out5 = jax.block_until_ready(i3d_head_forward(x5, fc_w, fc_b, tile_n=8))
    assert out5.shape == (16, K)
    assert jnp.allclose(out5, reference(x5, fc_w, fc_b), atol=1e-5, rtol=1e-5)

    print("KERNEL_OK")
</pallas_src>

<mosaic_0001>
module attributes {stable_mosaic.version = 11 : i64} {
  func.func @_single_step_kernel(%arg0: i32, %arg1: memref<2x32x64xf32, #tpu.memory_space<vmem>>, %arg2: memref<8x32xf32, #tpu.memory_space<vmem>>, %arg3: memref<1x2x8xf32, #tpu.memory_space<vmem>>) attributes {dimension_semantics = [#tpu.dimension_semantics<parallel>], iteration_bounds = array<i64: 1>, scalar_prefetch = 0 : i64, scratch_operands = 0 : i64, tpu.core_type = #tpu.core_type<tc>, window_params = [{transform_indices = @transform_0, window_bounds = array<i64: 2, 32, 64>}, {pipeline_mode = #tpu.pipeline_mode<synchronous>, transform_indices = @transform_1, window_bounds = array<i64: 8, 32>}, {transform_indices = @transform_2, window_bounds = array<i64: 1, 2, 8>}]} {
    %c0 = arith.constant 0 : index
    %c0_0 = arith.constant 0 : index
    %c0_1 = arith.constant 0 : index
    %0 = vector.load %arg1[%c0, %c0_0, %c0_1] : memref<2x32x64xf32, #tpu.memory_space<vmem>>, vector<2x32x64xf32>
    %cst = arith.constant dense<0.000000e+00> : vector<2x32xf32>
    %1 = vector.multi_reduction <add>, %0, %cst [2] : vector<2x32x64xf32> to vector<2x32xf32>
    %cst_2 = arith.constant 1.562500e-02 : f32
    %2 = vector.broadcast %cst_2 : f32 to vector<2x32xf32>
    %3 = arith.mulf %1, %2 : vector<2x32xf32>
    %c0_3 = arith.constant 0 : index
    %c0_4 = arith.constant 0 : index
    %4 = vector.load %arg2[%c0_3, %c0_4] : memref<8x32xf32, #tpu.memory_space<vmem>>, vector<8x32xf32>
    %cst_5 = arith.constant dense<0.000000e+00> : vector<2x8xf32>
    %5 = tpu.matmul %3, %4, %cst_5 {dimension_numbers = #tpu.dot_dimension_numbers<[1], [1], [0], [0], [0, 0, 1, 0], [], []>} : vector<2x32xf32>, vector<8x32xf32>, vector<2x8xf32> -> vector<2x8xf32>
    %c0_6 = arith.constant 0 : index
    %c0_7 = arith.constant 0 : index
    %c0_8 = arith.constant 0 : index
    %6 = vector.load %arg3[%c0_6, %c0_7, %c0_8] : memref<1x2x8xf32, #tpu.memory_space<vmem>>, vector<1x2x8xf32>
    %7 = vector.shape_cast %6 : vector<1x2x8xf32> to vector<2x8xf32>
    %8 = vector.shape_cast %5 : vector<2x8xf32> to vector<1x2x8xf32>
    tpu.vector_store %arg3[%c0_6, %c0_7, %c0_8], %8 {strides = array<i32>} : memref<1x2x8xf32, #tpu.memory_space<vmem>>, vector<1x2x8xf32>,
    return
  }
  func.func @transform_0(%arg0: i32) -> (i32, i32, i32) {
    %c0_i32 = arith.constant 0 : i32
    %c0_i32_0 = arith.constant 0 : i32
    %c0_i32_1 = arith.constant 0 : i32
    return %arg0, %c0_i32, %c0_i32_0 : i32, i32, i32
  }
  func.func @transform_1(%arg0: i32) -> (i32, i32) {
    %c0_i32 = arith.constant 0 : i32
    %c0_i32_0 = arith.constant 0 : i32
    %c0_i32_1 = arith.constant 0 : i32
    return %c0_i32, %c0_i32_0 : i32, i32
  }
  func.func @transform_2(%arg0: i32) -> (i32, i32, i32) {
    %c0_i32 = arith.constant 0 : i32
    %c0_i32_0 = arith.constant 0 : i32
    %c0_i32_1 = arith.constant 0 : i32
    return %c0_i32, %arg0, %c0_i32_0 : i32, i32, i32
  }
}

</mosaic_0001>

<bundles_post_ra>
// kernel: tpu_custom_call.1
= control target key start
LH: loop header
LB: loop body
LE: loop exit
PB: predicated region body
PF: predicated region fallthrough
CT: control target
= control target key end

     0   :  { %7 = vsyncpa [#allocation3], 0  ;;  %s388_s0 = inlined_call_operand.hbm [shape: f32[2,32,64], index: 0, kind: input, shape index: {}]   ;;  %s389_s1 = inlined_call_operand.hbm [shape: f32[8,32], index: 1, kind: input, shape index: {}]   ;;  %s390_s2 = inlined_call_operand.hbm [shape: f32[1,2,8], index: 2, kind: output, shape index: {}]  }
   0x1   :  { %8 = vsyncpa [#allocation6], 0 }
   0x2   :  { %9 = vsyncpa [#allocation4], 0  ;;  %s318_s9 = smov [#allocation2]   ;;  %s246_s13 = scalar_lea.hbm %s388_s0, 1024 }
   0x3   :  { %s15_s10 = sshll.u32 %s318_s9, 4  ;;  %p247_p0 = scmp.ne.s32.totalorder %s388_s0, %s246_s13  ;;  %s16_s10 = int_to_ptr.vmem [resolvable:$true] %s15_s10 }
   0x4   :  { %p250_p1 = scmp.lt.u32.totalorder %s246_s13, %s388_s0 }
   0x6   :  { %p252_p2 = pnand %p250_p1, %p247_p0 }
   0x8   :  { %255 = shalt.err (!%p252_p2)
}
   0x9   :  { %s256_s18 = scalar_lea.vmem %s16_s10, 1024  ;;  %p261_p4 = scmp.lt.s32.totalorder %s16_s10, %s16_s10 }
   0xa   :  { %p257_p3 = scmp.ne.s32.totalorder %s16_s10, %s256_s18  ;;  %p262_p5 = scmp.lt.s32.totalorder %s256_s18, %s256_s18 }
   0xc   :  { %p263_p6 = por %p262_p5, %p261_p4 }
   0xe   :  { %p264_p7 = pnand %p263_p6, %p257_p3 }
  0x10   :  { %267 = shalt.err (!%p264_p7)
}
  0x11   :  { %s319_s19 = smov 128   ;;  %s320_s20 = smov 8  }
  0x12   :  { %21 = dma.hbm_to_vmem [thread:$0]  %s388_s0, 1024, %s16_s10, [#allocation3], %s319_s19, %s319_s19, %s320_s20  }
  0x13   :  { %s321_s23 = smov [#allocation5]   ;;  %s268_s27 = scalar_lea.hbm %s389_s1, 128 }
  0x14   :  { %s28_s24 = sshll.u32 %s321_s23, 4  ;;  %p269_p8 = scmp.ne.s32.totalorder %s389_s1, %s268_s27  ;;  %s29_s24 = int_to_ptr.vmem [resolvable:$true] %s28_s24 }
  0x15   :  { %p272_p9 = scmp.lt.u32.totalorder %s268_s27, %s389_s1 }
  0x17   :  { %p274_p10 = pnand %p272_p9, %p269_p8 }
  0x19   :  { %277 = shalt.err (!%p274_p10)
}
  0x1a   :  { %s278_s4 = scalar_lea.vmem %s29_s24, 128  ;;  %p283_p12 = scmp.lt.s32.totalorder %s29_s24, %s29_s24 }
  0x1b   :  { %p279_p11 = scmp.ne.s32.totalorder %s29_s24, %s278_s4  ;;  %p284_p13 = scmp.lt.s32.totalorder %s278_s4, %s278_s4 }
  0x1d   :  { %p285_p0 = por %p284_p13, %p283_p12 }
  0x1f   :  { %p286_p1 = pnand %p285_p0, %p279_p11 }
  0x21   :  { %289 = shalt.err (!%p286_p1)
}
  0x22   :  { %31 = dma.hbm_to_vmem [thread:$0]  %s389_s1, 128, %s29_s24, [#allocation6]  }
  0x23   :  { %312 = dma.done.wait [#allocation3], 1024  }
  0x24   :  { %313 = vsyncadd [#allocation3], 4294966272 }
  0x25   :  { %314 = dma.done.wait [#allocation6], 128  }
  0x26   :  { %315 = vsyncadd [#allocation6], 4294967168  ;;  %vm46_vm0 = vcmask 523264   ;;  %v42_v0 = vld [vmem:[#allocation2 + $0x20] sm:$0xff]  ;;  %v43_v2 = vld [vmem:[#allocation2 + $0x28] sm:$0xff]  ;;  %v322_v16 = vmov 0.0   ;;  %v88_v18 = vlaneseq }
  0x27   :  { %v38_v1 = vld [vmem:[#allocation2] sm:$0xff]  ;;  %v59_v3 = vsel %vm46_vm0, %v42_v0, 0.0  ;;  %v39_v5 = vld [vmem:[#allocation2 + $0x8] sm:$0xff]  ;;  %v62_v6 = vsel %vm46_vm0, %v43_v2, 0.0  ;;  %v44_v8 = vld [vmem:[#allocation2 + $0x30] sm:$0xff]  ;;  %234 = vmatprep.subr.mxu0 %v322_v16  ;;  %vm136_vm1 = vcmask 261120  }
  0x28   :  { %v47_v4 = vsel %vm46_vm0, %v38_v1, 0.0  ;;  %60 = vadd.xlane.f32.xlu1 %v59_v3  ;;  %v50_v7 = vsel %vm46_vm0, %v39_v5, 0.0  ;;  %v40_v9 = vld [vmem:[#allocation2 + $0x10] sm:$0xff]  ;;  %v65_v10 = vsel %vm46_vm0, %v44_v8, 0.0  ;;  %v45_v12 = vld [vmem:[#allocation2 + $0x38] sm:$0xff]  ;;  %v79_v17 = vld [vmem:[#allocation5] sm:$0xff] }
  0x29   :  { %48 = vadd.xlane.f32.xlu0 %v47_v4  ;;  %v53_v11 = vsel %vm46_vm0, %v40_v9, 0.0  ;;  %v41_v13 = vld [vmem:[#allocation2 + $0x18] sm:$0xff]  ;;  %v68_v14 = vsel %vm46_vm0, %v45_v12, 0.0  ;;  %235 = vmatpush3.xpose.msk.msra.mxu0 %vm136_vm1, %v79_v17  ;;  %vm323_vm2 = vmmov 0   ;;  %v89_v21 = vand.u32 127, %v88_v18  ;;  %s324_s1 = smov [#allocation7]  }
  0x2a   :  { %v56_v15 = vsel %vm46_vm0, %v41_v13, 0.0  ;;  %236 = vmatprep.mubr.msk.f32.mxu0 %vm323_vm2, %v322_v16  ;;  %v91_v23 = vshrl.u32 %v88_v18, 7  ;;  %vm99_vm3 = vcmask 130112   ;;  %vm106_vm4 = vcmask 195712   ;;  %s220_s6 = sshll.u32 %s324_s1, 4  ;;  %s221_s6 = int_to_ptr.vmem [resolvable:$true] %s220_s6 }
  0x2b   :  { %v94_v22 = vadd.s32 4294967288, %v89_v21  ;;  %v101_v26 = vadd.s32 4294967280, %v89_v21  ;;  %v108_v30 = vadd.s32 4294967272, %v89_v21  ;;  %vm113_vm5 = vcmask 261312   ;;  %s290_s7 = scalar_lea.vmem %s221_s6, 32  ;;  %p295_p3 = scmp.lt.s32.totalorder %s221_s6, %s221_s6 }
  0x2c   :  { %63 = vadd.xlane.f32.xlu1 %v62_v6  ;;  %v92_v31 = vsub.s32 %v89_v21, %v91_v23  ;;  %vm134_vm6 = vcmask 1041409   ;;  %vm212_vm7 = vcmask 58368   ;;  %p291_p2 = scmp.ne.s32.totalorder %s221_s6, %s290_s7  ;;  %p296_p4 = scmp.lt.s32.totalorder %s290_s7, %s290_s7 }
  0x2d   :  { %51 = vadd.xlane.f32.xlu0 %v50_v7  ;;  %v97_v27 = vsub.s32 %v94_v22, %v91_v23  ;;  %v104_v32 = vsub.s32 %v101_v26, %v91_v23  ;;  %v111_v41 = vsub.s32 %v108_v30, %v91_v23 }
  0x2e   :  { %p297_p5 = por %p296_p4, %p295_p3 }
  0x30   :  { %66 = vadd.xlane.f32.xlu1 %v65_v10  ;;  %p298_p6 = pnand %p297_p5, %p291_p2 }
  0x31   :  { %54 = vadd.xlane.f32.xlu0 %v53_v11 }
  0x34   :  { %69 = vadd.xlane.f32.xlu1 %v68_v14 }
  0x35   :  { %57 = vadd.xlane.f32.xlu0 %v56_v15 }
  0xb5   :  { %v61_v19 = vpop.xlane.xlu1 %60 }
  0xb6   :  { %v49_v20 = vpop.xlane.xlu0 %48  ;;  %v75_v35 = vmul.f32 0.015625, %v61_v19 }
  0xb7   :  { %v71_v36 = vmul.f32 0.015625, %v49_v20 }
  0xb8   :  { %v118_v46 = vrot.slane %v75_v35, %v92_v31 }
  0xb9   :  { %v64_v24 = vpop.xlane.xlu1 %63  ;;  %v93_v47 = vrot.slane %v71_v36, %v92_v31 }
  0xba   :  { %v52_v25 = vpop.xlane.xlu0 %51  ;;  %v76_v28 = vmul.f32 0.015625, %v64_v24 }
  0xbb   :  { %v72_v29 = vmul.f32 0.015625, %v52_v25 }
  0xbc   :  { %v122_v39 = vrot.slane %v76_v28, %v97_v27 }
  0xbd   :  { %v67_v33 = vpop.xlane.xlu1 %66  ;;  %v98_v40 = vrot.slane %v72_v29, %v97_v27 }
  0xbe   :  { %v55_v34 = vpop.xlane.xlu0 %54  ;;  %v77_v37 = vmul.f32 0.015625, %v67_v33  ;;  %v123_v50 = vsel %vm99_vm3, %v122_v39, %v118_v46 }
  0xbf   :  { %v73_v38 = vmul.f32 0.015625, %v55_v34  ;;  %v100_v51 = vsel %vm99_vm3, %v98_v40, %v93_v47 }
  0xc0   :  { %v127_v42 = vrot.slane %v77_v37, %v104_v32 }
  0xc1   :  { %v105_v43 = vrot.slane %v73_v38, %v104_v32  ;;  %v70_v44 = vpop.xlane.xlu1 %69 }
  0xc2   :  { %v58_v45 = vpop.xlane.xlu0 %57  ;;  %v78_v48 = vmul.f32 0.015625, %v70_v44  ;;  %v128_v54 = vsel %vm106_vm4, %v127_v42, %v123_v50 }
  0xc3   :  { %v74_v49 = vmul.f32 0.015625, %v58_v45  ;;  %v107_v55 = vsel %vm106_vm4, %v105_v43, %v100_v51 }
  0xc4   :  { %v132_v52 = vrot.slane %v78_v48, %v111_v41 }
  0xc5   :  { %v112_v53 = vrot.slane %v74_v49, %v111_v41 }
  0xc6   :  { %v133_v57 = vsel %vm113_vm5, %v132_v52, %v128_v54 }
  0xc7   :  { %v114_v56 = vsel %vm113_vm5, %v112_v53, %v107_v55 }
  0xc8   :  { %v135_v58 = vsel %vm134_vm6, %v133_v57, %v114_v56 }
  0xc9   :  { %237 = vmatmul.mubr.msk.f32.vlgmr.msra.gmra.mrb[0].mxu0 %vm136_vm1, %v135_v58 }
 0x19c   :  { %v208_v59 = vpop.f32.mrb[0].mxu0 }
 0x19d   :  { %v238_v60 = vpop.f32.mrb[1].mxu0  ;;  %213 = vst.msk [vmem:[#allocation7] sm:$0x3] %vm212_vm7, %v208_v59 }
 0x19e   :  { %301 = shalt.err (!%p298_p6)
}
 0x19f   :  { %s302_s10 = scalar_lea.hbm %s390_s2, 32 }
 0x1a0   :  { %p303_p7 = scmp.ne.s32.totalorder %s390_s2, %s302_s10  ;;  %p306_p8 = scmp.lt.u32.totalorder %s302_s10, %s390_s2 }
 0x1a2   :  { %p308_p9 = pnand %p306_p8, %p303_p7 }
 0x1a4   :  { %311 = shalt.err (!%p308_p9)
}
 0x1a5   :  { %223 = dma.vmem_to_hbm [thread:$0]  %s221_s6, 32, %s390_s2, [#allocation4]  }
 0x1a6   :  { %316 = dma.done.wait [#allocation4], 32  }
 0x1a7   :  { %317 = vsyncadd [#allocation4], 4294967264 }
 0x1a8   :  { %227 = vsyncpa [#allocation3], 1 }
 0x1a9   :  { %228 = vsyncpa [#allocation6], 1 }
 0x1aa   :  { %229 = vsyncpa [#allocation4], 1 }

</bundles_post_ra>
